<compile_context>
chip_gen: v7x
topology: tpu7x:2x2x1
jax: 0.10.0
libtpu: 0.0.40
codegen_flags: <defaults>
</compile_context>

<pallas_src>
import functools

import jax
import jax.numpy as jnp
from jax.experimental import pallas as pl
from jax.experimental.pallas import tpu as pltpu


# ----------------------------------------------------------------------------
# VMEM budgeting (generation-aware)
# ----------------------------------------------------------------------------
def _vmem_capacity_bytes():
    try:
        return int(pltpu.get_tpu_info().vmem_capacity_bytes)
    except Exception:
        return 64 << 20            # conservative fallback (v7x per-core VMEM)


def _pick_vmem_limit(need_bytes):
    cap = _vmem_capacity_bytes()
    hi = int(cap * 0.72)           # leave headroom for compiler-internal scratch
    return int(min(max(need_bytes + (8 << 20), 32 << 20), hi))


# ----------------------------------------------------------------------------
# Shared epilogue: ReLU + in-register 2x2/stride-2 maxpool + bf16 store
# ----------------------------------------------------------------------------
def _relu_pool_store(o_ref, acc, *, apply_relu, fuse_pool):
    """acc: (H*W, Tco) float32.  o_ref already has the (pooled) output shape."""
    _, Ho, Wo, Tco = o_ref.shape
    if apply_relu:
        acc = jnp.maximum(acc, 0.0)
    if not fuse_pool:
        o_ref[...] = acc.reshape(1, Ho, Wo, Tco).astype(o_ref.dtype)
        return
    H, W = 2 * Ho, 2 * Wo
    # Pool in registers (no VMEM scratch round trip): two staged maxima.
    y = acc.reshape(H, Wo, 2, Tco)
    m1 = jnp.maximum(y[:, :, 0, :], y[:, :, 1, :])          # pool along W
    y2 = m1.reshape(Ho, 2, Wo, Tco)
    p = jnp.maximum(y2[:, 0, :, :], y2[:, 1, :, :])         # pool along H
    o_ref[...] = p.reshape(1, Ho, Wo, Tco).astype(o_ref.dtype)


# ----------------------------------------------------------------------------
# Pallas kernels
# ----------------------------------------------------------------------------
def _conv3x3_kernel(x_ref, w_ref, b_ref, o_ref, xp_ref, *, apply_relu,
                    fuse_pool, fold_all):
    """3x3 conv, stride 1, pad 1 (halo built in-kernel), fused ReLU/maxpool.

    x_ref:  (1, H, W, Cin)   bf16 input tile (one batch element)
    w_ref:  (9*Cin, Tco)     bf16 weights, rows ordered (kh, kw, cin)
    b_ref:  (1, Tco)         f32 bias
    o_ref:  (1, H, W, Tco) or (1, H//2, W//2, Tco)   bf16 output
    xp_ref: (H+2, W+2, Cin)  bf16 VMEM scratch (zero-padded halo)
    """
    _, H, W, Cin = x_ref.shape
    dt = xp_ref.dtype

    # ---- in-kernel pad=1 halo: zero border strips, copy interior -----------
    xp_ref[0:1, :, :] = jnp.zeros((1, W + 2, Cin), dt)
    xp_ref[H + 1:H + 2, :, :] = jnp.zeros((1, W + 2, Cin), dt)
    xp_ref[:, 0:1, :] = jnp.zeros((H + 2, 1, Cin), dt)
    xp_ref[:, W + 1:W + 2, :] = jnp.zeros((H + 2, 1, Cin), dt)
    xp_ref[1:H + 1, 1:W + 1, :] = x_ref[0]

    def tap(kh, kw):
        return xp_ref[kh:kh + H, kw:kw + W, :].reshape(H * W, Cin)

    # ---- folded-tap matmuls on the MXU, f32 accumulation --------------------
    if fold_all:
        # One K = 9*Cin matmul (Cin <= 128): single accumulator pass.
        patch = jnp.concatenate(
            [tap(kh, kw) for kh in range(3) for kw in range(3)], axis=-1)
        acc = jnp.dot(patch, w_ref[...], preferred_element_type=jnp.float32)
    else:
        # Three K = 3*Cin matmuls (one per kernel row).
        acc = None
        for kh in range(3):
            patch = jnp.concatenate([tap(kh, kw) for kw in range(3)], axis=-1)
            part = jnp.dot(patch, w_ref[kh * 3 * Cin:(kh + 1) * 3 * Cin, :],
                           preferred_element_type=jnp.float32)
            acc = part if acc is None else acc + part

    acc = acc + b_ref[...]                                  # (1, Tco) broadcast
    _relu_pool_store(o_ref, acc, apply_relu=apply_relu, fuse_pool=fuse_pool)


def _im2col_matmul_kernel(x_ref, w_ref, b_ref, o_ref, *, apply_relu, fuse_pool):
    """Conv as a single matmul on a pre-im2col'd input (Cin=3 first layer).

    x_ref: (1, H, W, K=9*Cin) bf16, w_ref: (K, Tco) bf16, b_ref: (1, Tco) f32.
    """
    _, H, W, K = x_ref.shape
    acc = jnp.dot(x_ref[0].reshape(H * W, K), w_ref[...],
                  preferred_element_type=jnp.float32)
    acc = acc + b_ref[...]
    _relu_pool_store(o_ref, acc, apply_relu=apply_relu, fuse_pool=fuse_pool)


def _maxpool2x2_kernel(x_ref, o_ref):
    """Standalone 2x2 max pool, stride 2 (only used if a pool isn't fused)."""
    _, H, W, C = x_ref.shape
    Ho, Wo = H // 2, W // 2
    y = x_ref[0].reshape(H, Wo, 2, C)
    m1 = jnp.maximum(y[:, :, 0, :], y[:, :, 1, :])
    y2 = m1.reshape(Ho, 2, Wo, C)
    p = jnp.maximum(y2[:, 0, :, :], y2[:, 1, :, :])
    o_ref[...] = p.reshape(1, Ho, Wo, C).astype(o_ref.dtype)


# ----------------------------------------------------------------------------
# Wrappers
# ----------------------------------------------------------------------------
def conv3x3(x, w, b, *, apply_relu, fuse_pool, tile_cout=None):
    """x: (N, H, W, Cin) NHWC, w: (3, 3, Cin, Cout), b: (Cout,). Returns bf16."""
    N, H, W, Cin = x.shape
    Cout = w.shape[-1]
    if tile_cout is None:
        tile_cout = 256 if Cout >= 256 else Cout    # fill 256-wide MXU on v6e/v7x
    tco = min(tile_cout, Cout)
    assert Cout % tco == 0
    n_co = Cout // tco
    if fuse_pool:
        assert H % 2 == 0 and W % 2 == 0
    Ho, Wo = (H // 2, W // 2) if fuse_pool else (H, W)

    x = x.astype(jnp.bfloat16)
    w2 = w.reshape(9 * Cin, Cout).astype(jnp.bfloat16)    # rows ordered (kh,kw,cin)
    b2 = b.reshape(1, Cout).astype(jnp.float32)

    cost = pl.CostEstimate(
        flops=2 * N * H * W * 9 * Cin * Cout,
        transcendentals=0,
        bytes_accessed=(N * H * W * Cin + 9 * Cin * Cout
                        + N * Ho * Wo * Cout) * 2 + Cout * 4)

    if Cin <= 8:
        # First-layer special case: host-side im2col -> single K = 9*Cin matmul.
        K = 9 * Cin
        xp = jnp.pad(x, ((0, 0), (1, 1), (1, 1), (0, 0)))
        xim = jnp.concatenate(
            [xp[:, kh:kh + H, kw:kw + W, :] for kh in range(3) for kw in range(3)],
            axis=-1)                                        # (N, H, W, 9*Cin)
        need = (2 * (H * W * K * 2 + K * tco * 2 + tco * 4 + Ho * Wo * tco * 2)
                + H * W * tco * 4)
        kernel = functools.partial(_im2col_matmul_kernel,
                                   apply_relu=apply_relu, fuse_pool=fuse_pool)
        return pl.pallas_call(
            kernel,
            out_shape=jax.ShapeDtypeStruct((N, Ho, Wo, Cout), jnp.bfloat16),
            grid=(n_co, N),
            in_specs=[
                pl.BlockSpec((1, H, W, K), lambda co, n: (n, 0, 0, 0)),
                pl.BlockSpec((K, tco), lambda co, n: (0, co)),
                pl.BlockSpec((1, tco), lambda co, n: (0, co)),
            ],
            out_specs=pl.BlockSpec((1, Ho, Wo, tco), lambda co, n: (n, 0, 0, co)),
            compiler_params=pltpu.CompilerParams(
                dimension_semantics=("parallel", "parallel"),
                vmem_limit_bytes=_pick_vmem_limit(need)),
            cost_estimate=cost,
        )(xim, w2, b2)

    fold_all = Cin <= 128      # one K=9*Cin matmul; otherwise 3 matmuls of K=3*Cin
    patch_k = (9 if fold_all else 3) * Cin
    blk = (H * W * Cin * 2          # x block (bf16)
           + 9 * Cin * tco * 2      # weight block (bf16)
           + tco * 4                # bias block (f32)
           + Ho * Wo * tco * 2)     # output block (bf16)
    tmp = ((H + 2) * (W + 2) * Cin * 2      # halo scratch (bf16)
           + H * W * patch_k * 2            # im2col patch temp (bf16)
           + H * W * tco * 4)               # f32 accumulator temp
    kernel = functools.partial(_conv3x3_kernel, apply_relu=apply_relu,
                               fuse_pool=fuse_pool, fold_all=fold_all)
    return pl.pallas_call(
        kernel,
        out_shape=jax.ShapeDtypeStruct((N, Ho, Wo, Cout), jnp.bfloat16),
        grid=(n_co, N),                 # batch innermost: weight block stays resident
        in_specs=[
            pl.BlockSpec((1, H, W, Cin), lambda co, n: (n, 0, 0, 0)),
            pl.BlockSpec((9 * Cin, tco), lambda co, n: (0, co)),
            pl.BlockSpec((1, tco), lambda co, n: (0, co)),
        ],
        out_specs=pl.BlockSpec((1, Ho, Wo, tco), lambda co, n: (n, 0, 0, co)),
        scratch_shapes=[pltpu.VMEM((H + 2, W + 2, Cin), jnp.bfloat16)],
        compiler_params=pltpu.CompilerParams(
            dimension_semantics=("parallel", "parallel"),
            vmem_limit_bytes=_pick_vmem_limit(2 * blk + tmp)),
        cost_estimate=cost,
    )(x, w2, b2)


def maxpool2x2(x):
    N, H, W, C = x.shape
    assert H % 2 == 0 and W % 2 == 0
    Ho, Wo = H // 2, W // 2
    return pl.pallas_call(
        _maxpool2x2_kernel,
        out_shape=jax.ShapeDtypeStruct((N, Ho, Wo, C), x.dtype),
        grid=(N,),
        in_specs=[pl.BlockSpec((1, H, W, C), lambda n: (n, 0, 0, 0))],
        out_specs=pl.BlockSpec((1, Ho, Wo, C), lambda n: (n, 0, 0, 0)),
        compiler_params=pltpu.CompilerParams(dimension_semantics=("parallel",)),
    )(x)


# ----------------------------------------------------------------------------
# TruncatedVGG19 layer selection (mirrors the PyTorch __init__ exactly)
# ----------------------------------------------------------------------------
VGG19_CFG = [64, 64, "M", 128, 128, "M", 256, 256, 256, 256, "M",
             512, 512, 512, 512, "M", 512, 512, 512, 512, "M"]


def vgg19_feature_layers():
    layers = []
    for v in VGG19_CFG:
        if v == "M":
            layers.append(("maxpool",))
        else:
            layers.append(("conv", v))
            layers.append(("relu",))
    return layers


def truncated_vgg19_layers(i, j):
    layers = vgg19_feature_layers()
    maxpool_counter = 0
    conv_counter = 0
    truncate_at = 0
    for layer in layers:
        truncate_at += 1
        if layer[0] == "conv":
            conv_counter += 1
        if layer[0] == "maxpool":
            maxpool_counter += 1
            conv_counter = 0
        if maxpool_counter == i - 1 and conv_counter == j:
            break
    return layers[:truncate_at + 1]


def init_params(layers, key, in_channels=3):
    params = []
    c = in_channels
    for layer in layers:
        if layer[0] == "conv":
            cout = layer[1]
            key, k1, k2 = jax.random.split(key, 3)
            w = jax.random.normal(k1, (3, 3, c, cout), jnp.float32) * 0.05
            b = jax.random.normal(k2, (cout,), jnp.float32) * 0.01
            params.append((w, b))
            c = cout
        else:
            params.append(None)
    return params


# ----------------------------------------------------------------------------
# Forward (PyTorch-equivalent): NCHW in/out, NHWC bf16 internally.
# conv + relu (+ maxpool) are fused into a single Pallas kernel per block.
# ----------------------------------------------------------------------------
def truncated_vgg19_forward(x_nchw, layers, params):
    x = jnp.transpose(x_nchw, (0, 2, 3, 1)).astype(jnp.bfloat16)  # NCHW -> NHWC
    n = len(layers)
    idx = 0
    while idx < n:
        kind = layers[idx][0]
        if kind == "conv":
            w, b = params[idx]
            has_relu = (idx + 1 < n) and layers[idx + 1][0] == "relu"
            has_pool = has_relu and (idx + 2 < n) and layers[idx + 2][0] == "maxpool"
            x = conv3x3(x, w, b, apply_relu=has_relu, fuse_pool=has_pool)
            idx += 1 + (1 if has_relu else 0) + (1 if has_pool else 0)
        elif kind == "maxpool":
            x = maxpool2x2(x)
            idx += 1
        else:  # standalone relu (does not occur in VGG19 features; kept for safety)
            x = jnp.maximum(x, 0).astype(jnp.bfloat16)
            idx += 1
    return jnp.transpose(x, (0, 3, 1, 2)).astype(jnp.float32)  # NHWC -> NCHW


# ----------------------------------------------------------------------------
# Pure-JAX reference with matching bf16 numerics (for correctness check)
# ----------------------------------------------------------------------------
def reference_forward(x_nchw, layers, params):
    x = x_nchw.astype(jnp.bfloat16)
    for idx, layer in enumerate(layers):
        if layer[0] == "conv":
            w, b = params[idx]
            w_oihw = jnp.transpose(w, (3, 2, 0, 1)).astype(jnp.bfloat16)
            y = jax.lax.conv_general_dilated(
                x, w_oihw, (1, 1), ((1, 1), (1, 1)),
                dimension_numbers=("NCHW", "OIHW", "NCHW"),
                preferred_element_type=jnp.float32)
            x = y + b[None, :, None, None].astype(jnp.float32)
        elif layer[0] == "relu":
            x = jnp.maximum(x, 0.0).astype(jnp.bfloat16)
        else:  # maxpool 2x2 stride 2
            N, C, H, W = x.shape
            x = x.reshape(N, C, H // 2, 2, W // 2, 2).max(axis=(3, 5))
    return x.astype(jnp.float32)


# ----------------------------------------------------------------------------
if __name__ == "__main__":
    i, j = 2, 2   # truncate at the 2nd conv after the 1st maxpool (+ its ReLU)
    layers = truncated_vgg19_layers(i, j)

    key = jax.random.PRNGKey(0)
    kp, kx = jax.random.split(key)
    params = init_params(layers, kp)

    # PyTorch-convention input: NCHW, 3 input channels (VGG expects RGB).
    x = jax.random.normal(kx, (2, 3, 16, 16), jnp.float32)

    out = jax.block_until_ready(truncated_vgg19_forward(x, layers, params))
    assert out.shape == (2, 128, 8, 8), out.shape

    ref = jax.block_until_ready(reference_forward(x, layers, params))
    scale = float(jnp.max(jnp.abs(ref))) + 1e-6
    max_err = float(jnp.max(jnp.abs(out - ref)))
    # Tolerance stays 1e-2: bf16 intermediate-activation rounding can diverge by
    # 1 ulp per layer between the two pipelines and compound over 4 conv layers.
    assert max_err / scale < 1e-2, f"mismatch vs reference: {max_err} (scale {scale})"

    print("KERNEL_OK")
</pallas_src>

<mosaic_0001>
module attributes {stable_mosaic.version = 11 : i64} {
  func.func @_im2col_matmul_kernel(%arg0: i32, %arg1: i32, %arg2: memref<1x16x16x27xbf16, #tpu.memory_space<vmem>>, %arg3: memref<27x64xbf16, #tpu.memory_space<vmem>>, %arg4: memref<1x64xf32, #tpu.memory_space<vmem>>, %arg5: memref<1x16x16x64xbf16, #tpu.memory_space<vmem>>) attributes {dimension_semantics = [#tpu.dimension_semantics<parallel>, #tpu.dimension_semantics<parallel>], iteration_bounds = array<i64: 1, 2>, scalar_prefetch = 0 : i64, scratch_operands = 0 : i64, tpu.core_type = #tpu.core_type<tc>, window_params = [{transform_indices = @transform_0, window_bounds = array<i64: 1, 16, 16, 27>}, {transform_indices = @transform_1, window_bounds = array<i64: 27, 64>}, {transform_indices = @transform_2, window_bounds = array<i64: 1, 64>}, {transform_indices = @transform_3, window_bounds = array<i64: 1, 16, 16, 64>}]} {
    %c0 = arith.constant 0 : index
    %c0_0 = arith.constant 0 : index
    %c0_1 = arith.constant 0 : index
    %c0_2 = arith.constant 0 : index
    %0 = vector.load %arg2[%c0, %c0_0, %c0_1, %c0_2] : memref<1x16x16x27xbf16, #tpu.memory_space<vmem>>, vector<1x16x16x27xbf16>
    %1 = vector.shape_cast %0 : vector<1x16x16x27xbf16> to vector<16x16x27xbf16>
    %2 = vector.shape_cast %1 : vector<16x16x27xbf16> to vector<256x27xbf16>
    %c0_3 = arith.constant 0 : index
    %c0_4 = arith.constant 0 : index
    %3 = vector.load %arg3[%c0_3, %c0_4] : memref<27x64xbf16, #tpu.memory_space<vmem>>, vector<27x64xbf16>
    %cst = arith.constant dense<0.000000e+00> : vector<256x64xf32>
    %4 = tpu.matmul %2, %3, %cst {dimension_numbers = #tpu.dot_dimension_numbers<[1], [0], [0], [1], [0, 0, 1, 1], [], []>} : vector<256x27xbf16>, vector<27x64xbf16>, vector<256x64xf32> -> vector<256x64xf32>
    %c0_5 = arith.constant 0 : index
    %c0_6 = arith.constant 0 : index
    %5 = vector.load %arg4[%c0_5, %c0_6] : memref<1x64xf32, #tpu.memory_space<vmem>>, vector<1x64xf32>
    %6 = vector.broadcast %5 : vector<1x64xf32> to vector<256x64xf32>
    %7 = arith.addf %4, %6 : vector<256x64xf32>
    %cst_7 = arith.constant 0.000000e+00 : f32
    %8 = vector.broadcast %cst_7 : f32 to vector<256x64xf32>
    %9 = arith.maximumf %7, %8 : vector<256x64xf32>
    %10 = vector.shape_cast %9 : vector<256x64xf32> to vector<1x16x16x64xf32>
    %11 = arith.truncf %10 : vector<1x16x16x64xf32> to vector<1x16x16x64xbf16>
    %c0_8 = arith.constant 0 : index
    %c0_9 = arith.constant 0 : index
    %c0_10 = arith.constant 0 : index
    %c0_11 = arith.constant 0 : index
    %12 = vector.load %arg5[%c0_8, %c0_9, %c0_10, %c0_11] : memref<1x16x16x64xbf16, #tpu.memory_space<vmem>>, vector<1x16x16x64xbf16>
    tpu.vector_store %arg5[%c0_8, %c0_9, %c0_10, %c0_11], %11 {strides = array<i32>} : memref<1x16x16x64xbf16, #tpu.memory_space<vmem>>, vector<1x16x16x64xbf16>,
    return
  }
  func.func @transform_0(%arg0: i32, %arg1: i32) -> (i32, i32, i32, i32) {
    %c0_i32 = arith.constant 0 : i32
    %c0_i32_0 = arith.constant 0 : i32
    %c0_i32_1 = arith.constant 0 : i32
    %c0_i32_2 = arith.constant 0 : i32
    return %arg1, %c0_i32, %c0_i32_0, %c0_i32_1 : i32, i32, i32, i32
  }
  func.func @transform_1(%arg0: i32, %arg1: i32) -> (i32, i32) {
    %c0_i32 = arith.constant 0 : i32
    %c0_i32_0 = arith.constant 0 : i32
    return %c0_i32, %arg0 : i32, i32
  }
  func.func @transform_2(%arg0: i32, %arg1: i32) -> (i32, i32) {
    %c0_i32 = arith.constant 0 : i32
    %c0_i32_0 = arith.constant 0 : i32
    return %c0_i32, %arg0 : i32, i32
  }
  func.func @transform_3(%arg0: i32, %arg1: i32) -> (i32, i32, i32, i32) {
    %c0_i32 = arith.constant 0 : i32
    %c0_i32_0 = arith.constant 0 : i32
    %c0_i32_1 = arith.constant 0 : i32
    return %arg1, %c0_i32, %c0_i32_0, %arg0 : i32, i32, i32, i32
  }
}

</mosaic_0001>

<bundles_post_ra>
// kernel: tpu_custom_call.1
= control target key start
LH: loop header
LB: loop body
LE: loop exit
PB: predicated region body
PF: predicated region fallthrough
CT: control target
= control target key end

     0   :  { %8 = vsyncpa [#allocation3], 0  ;;  %s1720_s0 = inlined_call_operand.hbm [shape: bf16[2,16,16,27], index: 0, kind: input, shape index: {}]   ;;  %s1721_s1 = inlined_call_operand.hbm [shape: bf16[27,64], index: 1, kind: input, shape index: {}]   ;;  %s1722_s2 = inlined_call_operand.vmem [shape: f32[1,64], index: 2, kind: input, shape index: {}]   ;;  %s1723_s3 = inlined_call_operand.hbm [shape: bf16[2,16,16,64], index: 3, kind: output, shape index: {}]  }
   0x1   :  { %10 = vsyncpa [#allocation3 + $0x1], 0 }
   0x2   :  { %11 = vsyncpa [#allocation6], 0 }
   0x3   :  { %12 = vsyncpa [#allocation4], 0 }
   0x4   :  { %14 = vsyncpa [#allocation4 + $0x1], 0  ;;  %s1353_s12 = smov 0   ;;  %s1355_s13 = smov 0  }
   0x5   :  { %s1357_s14 = smov 0   ;;  %s1359_s15 = smov 0  }
   0x6   :  { %s1361_s16 = smov 0   ;;  %s1363_s17 = smov 0  }
   0x7 LB: > { %s906_s18 = sadd.s32 4294967295, %s1323_s17   ;;  %s907_s19 = sadd.s32 4294967294, %s1323_s17   ;;  %s1323_s17 = sphi %s1363_s17, %s20_s17   ;;  %s1319_s16 = sphi %s1361_s16, %s1747_s16   ;;  %s1315_s15 = sphi %s1359_s15, %s1746_s15   ;;  %s1311_s14 = sphi %s1357_s14, %s1745_s14   ;;  %s1307_s13 = sphi %s1355_s13, %s1744_s13   ;;  %s1303_s12 = sphi %s1353_s12, %s1743_s12  }
   0x8   : > { %p52_p0 = scmp.ne.s32.totalorder %s1307_s13, %s1303_s12  ;;  %p1387_p1 = scmp.eq.s32.totalorder %s906_s18, 0 }
   0x9   : > { %p1391_p2 = scmp.eq.s32.totalorder %s906_s18, 1  ;;  %p136_p3 = scmp.eq.s32.totalorder %s907_s19, 1 }
   0xa   : > { %s1728_s20 = scalar_select %p1387_p1, 1, 0 }
   0xb   : > { %s1729_s21 = scalar_select %p1391_p2, 1, 0 }
   0xc   : > { %p1397_p4 = por %p1387_p1, %p52_p0  ;;  %p908_p5 = scmp.ge.s32.totalorder %s1323_s17, 1 }
   0xd   : > { %p1402_p6 = por %p136_p3, %p52_p0  ;;  %p143_p7 = scmp.lt.s32.totalorder %s1323_s17, 3 }
   0xe   : > { %s1730_s22 = scalar_select %p1397_p4, 1, 0 }
   0xf   : > { %s1731_s23 = scalar_select %p1402_p6, 1, 0 }
  0x10   : > { %p1407_p8 = pnand %p908_p5, %p143_p7  ;;  %s1325_s25 = smov [#allocation5]  }
  0x11   : > { %s157_s26 = sshll.u32 %s1325_s25, 4  ;;  %s29_s28 = sadd.s32 1, %s1319_s16  ;;  %s158_s26 = int_to_ptr.vmem [resolvable:$true] %s157_s26 }
  0x12   : > { %s1732_s24 = scalar_select %p1407_p8, 1, 0 }
  0x13   : > { %p1091_p9 = pneg %p1407_p8  ;;  %s1179_s4 = scalar_lea.hbm %s1721_s1, 256 }
  0x14   : > { %p1180_p12 = scmp.ne.s32.totalorder %s1721_s1, %s1179_s4  ;;  %p1186_p5 = scmp.lt.u32.totalorder %s1179_s4, %s1721_s1 }
  0x15   : > { %p1416_p11 = pnand %p1091_p9, %p1387_p1 }
  0x17   : > { %p1181_p13 = pneg %p1416_p11 }
  0x19   : > { %p1182_p0 = pnand %p1181_p13, %p1180_p12 }
  0x1b   : > { %p1183_p3 = pneg %p1182_p0 }
  0x1d   : > { %p1188_p7 = pnand %p1186_p5, %p1183_p3 }
  0x1f   : > { %1191 = shalt.err (!%p1188_p7)
}
  0x20   : > { %s1192_s9 = scalar_lea.vmem %s158_s26, 256  ;;  %p1200_p1 = scmp.lt.s32.totalorder %s158_s26, %s158_s26 }
  0x21   : > { %p1193_p9 = scmp.ne.s32.totalorder %s158_s26, %s1192_s9  ;;  %p1201_p4 = scmp.lt.s32.totalorder %s1192_s9, %s1192_s9 }
  0x23   : > { %p1195_p10 = pnand %p1193_p9, %p1181_p13  ;;  %p1202_p8 = por %p1201_p4, %p1200_p1 }
  0x25   : > { %p1196_p6 = pneg %p1195_p10 }
  0x27   : > { %p1203_p2 = pnand %p1202_p8, %p1196_p6 }
  0x29   : > { %1206 = shalt.err (!%p1203_p2)
}
  0x2a   : > { %s1326_s10 = smov 64   ;;  %s1327_s11 = smov 4  }
  0x2b   : > { %1094 = dma.hbm_to_vmem [thread:$0]  (!%p1416_p11), %s1721_s1, 256, %s158_s26, [#allocation6], %s1326_s10, %s1326_s10, %s1327_s11  }
  0x2c   : > { %p30_p1 = scmp.ge.s32.totalorder %s29_s28, 2  ;;  %s39_s25 = sadd.s32 1, %s1311_s14 }
  0x2d   : > { %p46_p2 = scmp.ne.s32.totalorder %s1311_s14, %s1307_s13  ;;  %p47_p4 = scmp.eq.s32.totalorder %s1323_s17, 0 }
  0x2e   : > { %s1749_s28 = smov (%p30_p1, %s29_s28), 0  ;;  %p1735_p8 = scmp.ne.s32.totalorder %s1729_s21, 0 }
  0x2f   : > { %p1446_p6 = por %p47_p4, %p46_p2  ;;  %s36_s30 = ssub.s32 %s1319_s16, %s1749_s28 }
  0x30   : > { %p1452_p10 = por %p1735_p8, %p46_p2  ;;  %p1104_p12 = scmp.lt.s32.totalorder %s1323_s17, 2 }
  0x31   : > { %p37_p11 = scmp.eq.s32.totalorder %s36_s30, 0  ;;  %s177_s26 = sand.u32 1, %s1311_s14  }
  0x32   : > { %s912_s4 = sshll.u32 %s177_s26, 7  ;;  %s991_s6 = sshll.u32 %s1319_s16, 11 }
  0x33   : > { %s1461_s5 = scalar_select %p37_p11, %s1311_s14, %s39_s25  }
  0x34   : > { %s1467_s9 = scalar_lea.hbm %s1720_s0, %s991_s6  ;;  %s181_s21 = scalar_lea.vmem [#allocation2], %s912_s4 }
  0x35   : > { %s188_s18 = sshll.u32 %s181_s21, 4  ;;  %p1473_p13 = pnand %p1104_p12, %p1446_p6  ;;  %s1469_s18 = int_to_ptr.vmem [resolvable:$true] %s188_s18 }
  0x36   : > { %s1477_s25 = scalar_lea.sflag [#allocation3], %s177_s26  ;;  %s1207_s30 = scalar_lea.hbm %s1467_s9, 2048 }
  0x37   : > { %p1208_p0 = scmp.ne.s32.totalorder %s1467_s9, %s1207_s30  ;;  %p1209_p3 = pneg %p1473_p13 }
  0x38   : > { %s1212_s29 = scalar_lea.hbm %s1720_s0, 4096  ;;  %p1213_p9 = scmp.lt.u32.totalorder %s1467_s9, %s1720_s0 }
  0x39   : > { %p1210_p5 = pnand %p1209_p3, %p1208_p0  ;;  %p1214_p1 = scmp.lt.u32.totalorder %s1212_s29, %s1207_s30 }
  0x3a   : > { %p1216_p4 = scmp.lt.u32.totalorder %s1207_s30, %s1467_s9 }
  0x3b   : > { %p1211_p7 = pneg %p1210_p5  ;;  %p1215_p2 = por %p1214_p1, %p1213_p9 }
  0x3d   : > { %p1217_p6 = por %p1216_p4, %p1215_p2 }
  0x3f   : > { %p1218_p8 = pnand %p1217_p6, %p1211_p7 }
  0x41   : > { %1221 = shalt.err (!%p1218_p8)
}
  0x42   : > { %s1222_s26 = scalar_lea.vmem %s1469_s18, 2048  ;;  %s1328_s21 = smov [#allocation2]  }
  0x43   : > { %p1223_p12 = scmp.ne.s32.totalorder %s1469_s18, %s1222_s26  ;;  %s1227_s4 = sshll.u32 %s1328_s21, 4  ;;  %s1228_s4 = int_to_ptr.vmem [resolvable:$false] %s1227_s4 }
  0x44   : > { %s1229_s6 = scalar_lea.vmem %s1228_s4, 4096  ;;  %p1230_p5 = scmp.lt.s32.totalorder %s1469_s18, %s1228_s4 }
  0x45   : > { %p1225_p11 = pnand %p1223_p12, %p1209_p3  ;;  %p1231_p9 = scmp.lt.s32.totalorder %s1229_s6, %s1222_s26 }
  0x47   : > { %p1226_p0 = pneg %p1225_p11  ;;  %p1232_p1 = por %p1231_p9, %p1230_p5 }
  0x49   : > { %p1233_p2 = pnand %p1232_p1, %p1226_p0 }
  0x4b   : > { %1236 = shalt.err (!%p1233_p2)
}
  0x4c   : > { %1098 = dma.hbm_to_vmem [thread:$0]  (!%p1473_p13), %s1467_s9, 2048, %s1469_s18, %s1477_s25, %s1326_s10, %s1326_s10, %s1327_s11  }
  0x4d   : > { %p1738_p3 = scmp.ne.s32.totalorder %s1732_s24, 0 }
  0x4e   : > { %s1511_s30 = sand.u32 (!%p1738_p3), 1, %s1307_s13   ;;  %p1739_p7 = scmp.ne.s32.totalorder (!%p1738_p3), %s1730_s22, 0 }
  0x4f   : > { %200 = sbr.rel (%p1738_p3) target bundleno = 360 (0x168), region = 32  ;;  %s916_s29 = sshll.u32 (!%p1738_p3), %s1511_s30, 7 }
  0x50   : > { %s203_s7 = scalar_lea.sflag (!%p1738_p3), [#allocation3], %s1511_s30  ;;  %s1517_s19 = scalar_lea.vmem (!%p1738_p3), [#allocation2], %s916_s29 }
  0x56   : > { %1290 = dma.done.wait (%p1739_p7), %s203_s7, 2048  }
  0x57   : > { %1292 = vsyncadd (%p1739_p7), %s203_s7, 4294965248  ;;  %p1740_p13 = scmp.ne.s32.totalorder %s1728_s20, 0 }
  0x59   : > { %1294 = dma.done.wait (%p1740_p13), [#allocation6], 256  }
  0x5a   : > { %1296 = vsyncadd (%p1740_p13), [#allocation6], 4294967040  ;;  %vm423_vm0 = vcmask 1044480   ;;  %vm424_vm1 = vcmask 1045504   ;;  %v1329_v0 = vmov 65535   ;;  %vm374_vm2 = vcmask 220160  }
  0x5b   : > { %v425_v1 = vsel %vm423_vm0, 4294967295, %v1329_v0  ;;  %v1161_v2 = vld [vmem:[#allocation5] sm:$0xff]   ;;  %v1162_v4 = vld [vmem:[#allocation5 + $0x8] sm:$0x3f]   ;;  %v1167_v10 = vld [vmem:[%s1517_s19 + $0x10] sm:$0xff]   ;;  %vm751_vm3 = vcmask 519168  }
  0x5c   : > { %v426_v3 = vsel %vm424_vm1, %v425_v1, 0  ;;  %1043 = vmatprep.subr.bf16.mxu0 %v1161_v2  ;;  %1079 = vmatprep.subr.bf16.mxu1 %v1161_v2  ;;  %v1163_v5 = vld [vmem:[%s1517_s19] sm:$0xff]   ;;  %v1165_v8 = vld [vmem:[%s1517_s19 + $0x8] sm:$0xff]   ;;  %v1168_v11 = vld [vmem:[%s1517_s19 + $0x50] sm:$0xff]   ;;  %s1574_s24 = scalar_lea.vmem [#allocation7], %s916_s29  ;;  %s1024_s10 = sshll.u32 %s1315_s15, 11 }
  0x5d   : > { %1044 = vmatpush3.bf16.msra.mxu0 %v1161_v2  ;;  %1081 = vmatpush3.bf16.msra.mxu1 %v1161_v2  ;;  %v428_v6 = vand.u32 %v1162_v4, %v426_v3  ;;  %v1164_v7 = vld [vmem:[%s1517_s19 + $0x40] sm:$0xff]   ;;  %v1166_v9 = vld [vmem:[%s1517_s19 + $0x48] sm:$0xff]   ;;  %v1169_v12 = vld [vmem:[%s1517_s19 + $0x18] sm:$0xff]   ;;  %s799_s11 = sshll.u32 %s1574_s24, 4  ;;  %s1657_s18 = scalar_lea.hbm %s1723_s3, %s1024_s10  ;;  %s1659_s11 = int_to_ptr.vmem [resolvable:$true] %s799_s11 }
  0x5e   : > { %1047 = vmatprep.mubr.msk.bf16.mxu0 %vm374_vm2, %v1163_v5  ;;  %1063 = vmatprep.mubr.msk.bf16.mxu1 %vm374_vm2, %v1164_v7  ;;  %v1170_v13 = vld [vmem:[%s1517_s19 + $0x58] sm:$0xff]   ;;  %v1171_v14 = vld [vmem:[%s1517_s19 + $0x20] sm:$0xff]   ;;  %v1173_v16 = vld [vmem:[%s1517_s19 + $0x28] sm:$0xff]   ;;  %s785_s25 = scalar_lea.sflag [#allocation4], %s1511_s30  ;;  %s1237_s8 = scalar_lea.vmem %s1659_s11, 2048 }
  0x5f   : > { %1045 = vmatprep.subr.bf16.mxu0 %v428_v6  ;;  %1080 = vmatprep.subr.bf16.mxu1 %v428_v6  ;;  %v1172_v15 = vld [vmem:[%s1517_s19 + $0x60] sm:$0xff]   ;;  %v1174_v17 = vld [vmem:[%s1517_s19 + $0x68] sm:$0xff]   ;;  %v1175_v18 = vld [vmem:[%s1517_s19 + $0x30] sm:$0xff]   ;;  %p1238_p4 = scmp.ne.s32.totalorder %s1659_s11, %s1237_s8  ;;  %s1330_s26 = smov [#allocation7]  }
  0x60   : > { %v1176_v19 = vld [vmem:[%s1517_s19 + $0x70] sm:$0xff]   ;;  %v1177_v20 = vld [vmem:[%s1517_s19 + $0x38] sm:$0xff]   ;;  %v1562_v22 = vld [vmem:[%s1722_s2] ss:$0 sm:$0xff]  ;;  %s1241_s21 = sshll.u32 %s1330_s26, 4  ;;  %s1242_s21 = int_to_ptr.vmem [resolvable:$false] %s1241_s21 }
  0x61   : > { %1046 = vmatpush3.bf16.msra.mxu0 %v428_v6  ;;  %1082 = vmatpush3.bf16.msra.mxu1 %v428_v6  ;;  %v1178_v21 = vld [vmem:[%s1517_s19 + $0x78] sm:$0xff]   ;;  %p1239_p6 = pnand %p1238_p4, %p1452_p10  ;;  %s1243_s4 = scalar_lea.vmem %s1242_s21, 4096 }
  0x62   : > { %p1244_p12 = scmp.lt.s32.totalorder %s1659_s11, %s1242_s21  ;;  %p1245_p11 = scmp.lt.s32.totalorder %s1243_s4, %s1237_s8 }
  0x63   : > { %p1240_p8 = pneg %p1239_p6 }
  0x64   : > { %1048 = vmatmul.mubr.msk.bf16.vlgmr.msra.gmra.mrb[0].mxu0 %vm374_vm2, %v1165_v8  ;;  %1064 = vmatmul.mubr.msk.bf16.vlgmr.msra.gmra.mrb[0].mxu1 %vm374_vm2, %v1166_v9  ;;  %p1246_p0 = por %p1245_p11, %p1244_p12 }
  0x65   : > { %1051 = vmatprep.mubr.msk.bf16.mxu0 %vm374_vm2, %v1167_v10  ;;  %1067 = vmatprep.mubr.msk.bf16.mxu1 %vm374_vm2, %v1168_v11 }
  0x66   : > { %p1247_p5 = pnand %p1246_p0, %p1240_p8 }
  0x6c   : > { %1052 = vmatmul.mubr.msk.bf16.gmra.mrb[4].mxu0 %vm374_vm2, %v1169_v12  ;;  %1068 = vmatmul.mubr.msk.bf16.gmra.mrb[4].mxu1 %vm374_vm2, %v1170_v13 }
  0x6d   : > { %1055 = vmatprep.mubr.msk.bf16.mxu0 %vm374_vm2, %v1171_v14  ;;  %1071 = vmatprep.mubr.msk.bf16.mxu1 %vm374_vm2, %v1172_v15 }
  0x74   : > { %1056 = vmatmul.mubr.msk.bf16.gmra.mrb[8].mxu0 %vm374_vm2, %v1173_v16  ;;  %1072 = vmatmul.mubr.msk.bf16.gmra.mrb[8].mxu1 %vm374_vm2, %v1174_v17 }
  0x75   : > { %1059 = vmatprep.mubr.msk.bf16.mxu0 %vm374_vm2, %v1175_v18  ;;  %1075 = vmatprep.mubr.msk.bf16.mxu1 %vm374_vm2, %v1176_v19 }
  0x7c   : > { %1060 = vmatmul.mubr.msk.bf16.gmra.mrb[12].mxu0 %vm374_vm2, %v1177_v20  ;;  %1076 = vmatmul.mubr.msk.bf16.gmra.mrb[12].mxu1 %vm374_vm2, %v1178_v21 }
 0x137   : > { %v1049_v23 = vpop.f32.mrb[0].mxu0  ;;  %v1065_v24 = vpop.f32.mrb[0].mxu1 }
 0x138   : > { %v473_v25 = vadd.f32 %v1049_v23, %v1562_v22  ;;  %v537_v26 = vadd.f32 %v1065_v24, %v1562_v22  ;;  %v464_v27 = vpop.f32.mrb[1].mxu0  ;;  %v528_v28 = vpop.f32.mrb[1].mxu1 }
 0x139   : > { %v465_v29 = vadd.f32 %v1562_v22, %v464_v27  ;;  %v529_v30 = vadd.f32 %v1562_v22, %v528_v28  ;;  %v1050_v31 = vpop.f32.mrb[2].mxu0  ;;  %v1066_v32 = vpop.f32.mrb[2].mxu1 }
 0x13a   : > { %v593_v33 = vmax.f32 %v473_v25, 0.0  ;;  %v609_v34 = vmax.f32 %v537_v26, 0.0  ;;  %v476_v35 = vadd.f32 %v1050_v31, %v1562_v22  ;;  %v540_v36 = vadd.f32 %v1066_v32, %v1562_v22  ;;  %v467_v37 = vpop.f32.mrb[3].mxu0  ;;  %v531_v38 = vpop.f32.mrb[3].mxu1 }
 0x13b   : > { %v591_v39 = vmax.f32 %v465_v29, 0.0  ;;  %v607_v40 = vmax.f32 %v529_v30, 0.0  ;;  %v468_v41 = vadd.f32 %v1562_v22, %v467_v37  ;;  %v532_v42 = vadd.f32 %v1562_v22, %v531_v38 }
 0x13c   : > { %v994_v43 = vpack.c.bf16 %v593_v33, %v593_v33  ;;  %v1010_v44 = vpack.c.bf16 %v609_v34, %v609_v34  ;;  %v594_v45 = vmax.f32 %v476_v35, 0.0  ;;  %v610_v46 = vmax.f32 %v540_v36, 0.0 }
 0x13d   : > { %v992_v47 = vpack.c.bf16 %v591_v39, %v591_v39  ;;  %v1008_v48 = vpack.c.bf16 %v607_v40, %v607_v40  ;;  %v592_v49 = vmax.f32 %v468_v41, 0.0  ;;  %v608_v50 = vmax.f32 %v532_v42, 0.0 }
 0x13e   : > { %754 = vst.msk [vmem:[%s1574_s24 + $0x8] sm:$0xf] %vm751_vm3, %v994_v43  ;;  %770 = vst.msk [vmem:[%s1574_s24 + $0x48] sm:$0xf] %vm751_vm3, %v1010_v44  ;;  %v995_v51 = vpack.c.bf16 %v594_v45, %v594_v45  ;;  %v1011_v52 = vpack.c.bf16 %v610_v46, %v610_v46 }
 0x13f   : > { %752 = vst.msk [vmem:[%s1574_s24] sm:$0xf] %vm751_vm3, %v992_v47  ;;  %768 = vst.msk [vmem:[%s1574_s24 + $0x40] sm:$0xf] %vm751_vm3, %v1008_v48  ;;  %v993_v53 = vpack.c.bf16 %v592_v49, %v592_v49  ;;  %v1009_v54 = vpack.c.bf16 %v608_v50, %v608_v50  ;;  %v1053_v55 = vpop.f32.mrb[4].mxu0  ;;  %v1069_v56 = vpop.f32.mrb[4].mxu1 }
 0x140   : > { %755 = vst.msk [vmem:[%s1574_s24 + $0xc] sm:$0xf] %vm751_vm3, %v995_v51  ;;  %771 = vst.msk [vmem:[%s1574_s24 + $0x4c] sm:$0xf] %vm751_vm3, %v1011_v52  ;;  %v489_v57 = vadd.f32 %v1053_v55, %v1562_v22  ;;  %v553_v58 = vadd.f32 %v1069_v56, %v1562_v22  ;;  %v480_v59 = vpop.f32.mrb[5].mxu0  ;;  %v544_v60 = vpop.f32.mrb[5].mxu1 }
 0x141   : > { %753 = vst.msk [vmem:[%s1574_s24 + $0x4] sm:$0xf] %vm751_vm3, %v993_v53  ;;  %769 = vst.msk [vmem:[%s1574_s24 + $0x44] sm:$0xf] %vm751_vm3, %v1009_v54  ;;  %v481_v61 = vadd.f32 %v1562_v22, %v480_v59  ;;  %v545_v62 = vadd.f32 %v1562_v22, %v544_v60  ;;  %v1054_v63 = vpop.f32.mrb[6].mxu0  ;;  %v1070_v0 = vpop.f32.mrb[6].mxu1 }
 0x142   : > { %v597_v1 = vmax.f32 %v489_v57, 0.0  ;;  %v613_v2 = vmax.f32 %v553_v58, 0.0  ;;  %v492_v3 = vadd.f32 %v1054_v63, %v1562_v22  ;;  %v556_v4 = vadd.f32 %v1070_v0, %v1562_v22  ;;  %v483_v5 = vpop.f32.mrb[7].mxu0  ;;  %v547_v6 = vpop.f32.mrb[7].mxu1 }
 0x143   : > { %v595_v7 = vmax.f32 %v481_v61, 0.0  ;;  %v611_v8 = vmax.f32 %v545_v62, 0.0  ;;  %v484_v9 = vadd.f32 %v1562_v22, %v483_v5  ;;  %v548_v10 = vadd.f32 %v1562_v22, %v547_v6 }
 0x144   : > { %v998_v11 = vpack.c.bf16 %v597_v1, %v597_v1  ;;  %v1014_v12 = vpack.c.bf16 %v613_v2, %v613_v2  ;;  %v598_v13 = vmax.f32 %v492_v3, 0.0  ;;  %v614_v14 = vmax.f32 %v556_v4, 0.0 }
 0x145   : > { %v996_v15 = vpack.c.bf16 %v595_v7, %v595_v7  ;;  %v1012_v16 = vpack.c.bf16 %v611_v8, %v611_v8  ;;  %v596_v17 = vmax.f32 %v484_v9, 0.0  ;;  %v612_v18 = vmax.f32 %v548_v10, 0.0 }
 0x146   : > { %758 = vst.msk [vmem:[%s1574_s24 + $0x18] sm:$0xf] %vm751_vm3, %v998_v11  ;;  %774 = vst.msk [vmem:[%s1574_s24 + $0x58] sm:$0xf] %vm751_vm3, %v1014_v12  ;;  %v999_v19 = vpack.c.bf16 %v598_v13, %v598_v13  ;;  %v1015_v20 = vpack.c.bf16 %v614_v14, %v614_v14 }
 0x147   : > { %756 = vst.msk [vmem:[%s1574_s24 + $0x10] sm:$0xf] %vm751_vm3, %v996_v15  ;;  %772 = vst.msk [vmem:[%s1574_s24 + $0x50] sm:$0xf] %vm751_vm3, %v1012_v16  ;;  %v997_v21 = vpack.c.bf16 %v596_v17, %v596_v17  ;;  %v1013_v23 = vpack.c.bf16 %v612_v18, %v612_v18  ;;  %v1057_v24 = vpop.f32.mrb[8].mxu0  ;;  %v1073_v25 = vpop.f32.mrb[8].mxu1 }
 0x148   : > { %759 = vst.msk [vmem:[%s1574_s24 + $0x1c] sm:$0xf] %vm751_vm3, %v999_v19  ;;  %775 = vst.msk [vmem:[%s1574_s24 + $0x5c] sm:$0xf] %vm751_vm3, %v1015_v20  ;;  %v505_v26 = vadd.f32 %v1057_v24, %v1562_v22  ;;  %v569_v27 = vadd.f32 %v1073_v25, %v1562_v22  ;;  %v496_v28 = vpop.f32.mrb[9].mxu0  ;;  %v560_v29 = vpop.f32.mrb[9].mxu1 }
 0x149   : > { %757 = vst.msk [vmem:[%s1574_s24 + $0x14] sm:$0xf] %vm751_vm3, %v997_v21  ;;  %773 = vst.msk [vmem:[%s1574_s24 + $0x54] sm:$0xf] %vm751_vm3, %v1013_v23  ;;  %v497_v30 = vadd.f32 %v1562_v22, %v496_v28  ;;  %v561_v31 = vadd.f32 %v1562_v22, %v560_v29  ;;  %v1058_v32 = vpop.f32.mrb[10].mxu0  ;;  %v1074_v33 = vpop.f32.mrb[10].mxu1 }
 0x14a   : > { %v601_v34 = vmax.f32 %v505_v26, 0.0  ;;  %v617_v35 = vmax.f32 %v569_v27, 0.0  ;;  %v508_v36 = vadd.f32 %v1058_v32, %v1562_v22  ;;  %v572_v37 = vadd.f32 %v1074_v33, %v1562_v22  ;;  %v499_v38 = vpop.f32.mrb[11].mxu0  ;;  %v563_v39 = vpop.f32.mrb[11].mxu1 }
 0x14b   : > { %v599_v40 = vmax.f32 %v497_v30, 0.0  ;;  %v615_v41 = vmax.f32 %v561_v31, 0.0  ;;  %v500_v42 = vadd.f32 %v1562_v22, %v499_v38  ;;  %v564_v43 = vadd.f32 %v1562_v22, %v563_v39 }
 0x14c   : > { %v1002_v44 = vpack.c.bf16 %v601_v34, %v601_v34  ;;  %v1018_v45 = vpack.c.bf16 %v617_v35, %v617_v35  ;;  %v602_v46 = vmax.f32 %v508_v36, 0.0  ;;  %v618_v47 = vmax.f32 %v572_v37, 0.0 }
 0x14d   : > { %v1000_v48 = vpack.c.bf16 %v599_v40, %v599_v40  ;;  %v1016_v49 = vpack.c.bf16 %v615_v41, %v615_v41  ;;  %v600_v50 = vmax.f32 %v500_v42, 0.0  ;;  %v616_v51 = vmax.f32 %v564_v43, 0.0 }
 0x14e   : > { %762 = vst.msk [vmem:[%s1574_s24 + $0x28] sm:$0xf] %vm751_vm3, %v1002_v44  ;;  %778 = vst.msk [vmem:[%s1574_s24 + $0x68] sm:$0xf] %vm751_vm3, %v1018_v45  ;;  %v1003_v52 = vpack.c.bf16 %v602_v46, %v602_v46  ;;  %v1019_v53 = vpack.c.bf16 %v618_v47, %v618_v47 }
 0x14f   : > { %760 = vst.msk [vmem:[%s1574_s24 + $0x20] sm:$0xf] %vm751_vm3, %v1000_v48  ;;  %776 = vst.msk [vmem:[%s1574_s24 + $0x60] sm:$0xf] %vm751_vm3, %v1016_v49  ;;  %v1001_v54 = vpack.c.bf16 %v600_v50, %v600_v50  ;;  %v1017_v55 = vpack.c.bf16 %v616_v51, %v616_v51  ;;  %v1061_v56 = vpop.f32.mrb[12].mxu0  ;;  %v1077_v57 = vpop.f32.mrb[12].mxu1 }
 0x150   : > { %763 = vst.msk [vmem:[%s1574_s24 + $0x2c] sm:$0xf] %vm751_vm3, %v1003_v52  ;;  %779 = vst.msk [vmem:[%s1574_s24 + $0x6c] sm:$0xf] %vm751_vm3, %v1019_v53  ;;  %v521_v58 = vadd.f32 %v1061_v56, %v1562_v22  ;;  %v585_v59 = vadd.f32 %v1077_v57, %v1562_v22  ;;  %v512_v60 = vpop.f32.mrb[13].mxu0  ;;  %v576_v61 = vpop.f32.mrb[13].mxu1 }
 0x151   : > { %761 = vst.msk [vmem:[%s1574_s24 + $0x24] sm:$0xf] %vm751_vm3, %v1001_v54  ;;  %777 = vst.msk [vmem:[%s1574_s24 + $0x64] sm:$0xf] %vm751_vm3, %v1017_v55  ;;  %v513_v62 = vadd.f32 %v1562_v22, %v512_v60  ;;  %v577_v63 = vadd.f32 %v1562_v22, %v576_v61  ;;  %v1062_v0 = vpop.f32.mrb[14].mxu0  ;;  %v1078_v1 = vpop.f32.mrb[14].mxu1 }
 0x152   : > { %v605_v2 = vmax.f32 %v521_v58, 0.0  ;;  %v621_v3 = vmax.f32 %v585_v59, 0.0  ;;  %v524_v4 = vadd.f32 %v1062_v0, %v1562_v22  ;;  %v588_v5 = vadd.f32 %v1078_v1, %v1562_v22  ;;  %v515_v6 = vpop.f32.mrb[15].mxu0  ;;  %v579_v7 = vpop.f32.mrb[15].mxu1 }
 0x153   : > { %v603_v8 = vmax.f32 %v513_v62, 0.0  ;;  %v619_v9 = vmax.f32 %v577_v63, 0.0  ;;  %v516_v10 = vadd.f32 %v1562_v22, %v515_v6  ;;  %v580_v11 = vadd.f32 %v1562_v22, %v579_v7 }
 0x154   : > { %v1006_v12 = vpack.c.bf16 %v605_v2, %v605_v2  ;;  %v1022_v13 = vpack.c.bf16 %v621_v3, %v621_v3  ;;  %v606_v14 = vmax.f32 %v524_v4, 0.0  ;;  %v622_v15 = vmax.f32 %v588_v5, 0.0 }
 0x155   : > { %v1004_v16 = vpack.c.bf16 %v603_v8, %v603_v8  ;;  %v1020_v17 = vpack.c.bf16 %v619_v9, %v619_v9  ;;  %v604_v18 = vmax.f32 %v516_v10, 0.0  ;;  %v620_v19 = vmax.f32 %v580_v11, 0.0 }
 0x156   : > { %766 = vst.msk [vmem:[%s1574_s24 + $0x38] sm:$0xf] %vm751_vm3, %v1006_v12  ;;  %782 = vst.msk [vmem:[%s1574_s24 + $0x78] sm:$0xf] %vm751_vm3, %v1022_v13  ;;  %v1007_v22 = vpack.c.bf16 %v606_v14, %v606_v14  ;;  %v1023_v20 = vpack.c.bf16 %v622_v15, %v622_v15 }
 0x157   : > { %764 = vst.msk [vmem:[%s1574_s24 + $0x30] sm:$0xf] %vm751_vm3, %v1004_v16  ;;  %780 = vst.msk [vmem:[%s1574_s24 + $0x70] sm:$0xf] %vm751_vm3, %v1020_v17  ;;  %v1005_v21 = vpack.c.bf16 %v604_v18, %v604_v18  ;;  %v1021_v23 = vpack.c.bf16 %v620_v19, %v620_v19 }
 0x158   : > { %767 = vst.msk [vmem:[%s1574_s24 + $0x3c] sm:$0xf] %vm751_vm3, %v1007_v22  ;;  %783 = vst.msk [vmem:[%s1574_s24 + $0x7c] sm:$0xf] %vm751_vm3, %v1023_v20 }
 0x159   : > { %765 = vst.msk [vmem:[%s1574_s24 + $0x34] sm:$0xf] %vm751_vm3, %v1005_v21  ;;  %781 = vst.msk [vmem:[%s1574_s24 + $0x74] sm:$0xf] %vm751_vm3, %v1021_v23 }
 0x15a   : > { %1250 = shalt.err (!%p1247_p5)
}
 0x15b   : > { %s1251_s6 = scalar_lea.hbm %s1657_s18, 2048  ;;  %s1255_s19 = scalar_lea.hbm %s1723_s3, 4096 }
 0x15c   : > { %p1252_p9 = scmp.ne.s32.totalorder %s1657_s18, %s1251_s6  ;;  %p1256_p3 = scmp.lt.u32.totalorder %s1657_s18, %s1723_s3 }
 0x15d   : > { %p1257_p7 = scmp.lt.u32.totalorder %s1255_s19, %s1251_s6  ;;  %p1259_p4 = scmp.lt.u32.totalorder %s1251_s6, %s1657_s18 }
 0x15e   : > { %p1253_p1 = pnand %p1252_p9, %p1452_p10 }
 0x15f   : > { %p1258_p13 = por %p1257_p7, %p1256_p3 }
 0x160   : > { %p1254_p2 = pneg %p1253_p1 }
 0x161   : > { %p1260_p6 = por %p1259_p4, %p1258_p13 }
 0x163   : > { %p1261_p8 = pnand %p1260_p6, %p1254_p2 }
 0x165   : > { %1264 = shalt.err (!%p1261_p8)
}
 0x166   : > { %s1331_s24 = smov 64   ;;  %s1332_s10 = smov 4  }
 0x167   : > { %1089 = dma.vmem_to_hbm [thread:$0]  (%p1452_p10), %s1659_s11, 2048, %s1657_s18, %s785_s25, %s1331_s24, %s1331_s24, %s1332_s10  }
 0x168 PF: > { %s814_s15 = sand.u32 1, %s1303_s12   ;;  %p1741_p12 = scmp.ne.s32.totalorder %s1731_s23, 0 }
 0x169   : > { %p1742_p11 = scmp.ge.s32.totalorder %s1323_s17, 2  ;;  %s815_s9 = scalar_lea.sflag [#allocation4], %s814_s15 }
 0x16b   : > { %p1100_p0 = pnand %p1742_p11, %p1741_p12 }
 0x16d   : > { %1298 = dma.done.wait (!%p1100_p0), %s815_s9, 2048  }
 0x16e   : > { %1300 = vsyncadd (!%p1100_p0), %s815_s9, 4294965248  ;;  %s20_s17 = sadd.s32 1, %s1323_s17   ;;  %s1743_s12 = smov %s1307_s13 }
 0x16f   : > { %p17_p5 = scmp.ge.s32.totalorder %s20_s17, 4   ;;  %s1744_s13 = smov %s1311_s14 }
 0x170   : > { %s1745_s14 = smov %s1461_s5  ;;  %s1746_s15 = smov %s1319_s16 }
 0x171   : > { %s1747_s16 = smov %s1749_s28  ;;  %19 = sbr.rel (!%p17_p5) target bundleno = 7 (0x7), region = 85 }
 0x178   :  { %820 = vsyncpa [#allocation3], 1 }
 0x179   :  { %822 = vsyncpa [#allocation3 + $0x1], 1 }
 0x17a   :  { %823 = vsyncpa [#allocation6], 1 }
 0x17b   :  { %824 = vsyncpa [#allocation4], 1 }
 0x17c   :  { %826 = vsyncpa [#allocation4 + $0x1], 1 }

</bundles_post_ra>
